<compile_context>
chip_gen: v7x
topology: tpu7x:2x2x1
jax: 0.10.0
libtpu: 0.0.40
codegen_flags: <defaults>
</compile_context>

<pallas_src>
import functools

import jax
import jax.numpy as jnp
from jax.experimental import pallas as pl
from jax.experimental.pallas import tpu as pltpu

ALPHA = 1.0
BETA = 1.0
MARGIN = 1.0
_PAIRWISE_EPS = 1e-6  # torch.nn.functional.pairwise_distance default eps


def _vmem_capacity_bytes():
    """Physical VMEM capacity (per TensorCore), with a conservative fallback."""
    try:
        info = pltpu.get_tpu_info()
        cap = getattr(info, "vmem_capacity_bytes", None)
        if cap:
            return int(cap)
    except Exception:
        pass
    return 64 << 20  # v7x per-TC VMEM; safe lower bound for v5e/v6e too.


def _contrastive_loss_kernel(o1_ref, o2_ref, y_ref, out_ref, *,
                             alpha, beta, m, total_b, tile_b,
                             mask_remainder, sub_in_input_dtype):
    pid = pl.program_id(0)

    # Main (TB, D) elementwise path.  For bf16/f16 inputs subtract in the narrow
    # dtype (native bf16 VALU on v6e/v7x), widening once for eps/square/reduce.
    if sub_in_input_dtype:
        diff = (o1_ref[...] - o2_ref[...]).astype(jnp.float32) + _PAIRWISE_EPS
    else:
        diff = (o1_ref[...].astype(jnp.float32)
                - o2_ref[...].astype(jnp.float32)) + _PAIRWISE_EPS

    d2 = jnp.sum(diff * diff, axis=-1, keepdims=True)        # (TB, 1) XLU reduce
    d = jnp.sqrt(d2)                                          # only the margin term needs sqrt

    y = y_ref[...].astype(jnp.float32)                        # (TB, 1)
    pos = y * d2 if alpha == 1.0 else (alpha * y) * d2        # no sqrt->square round trip
    margin = jnp.square(jnp.maximum(m - d, 0.0))
    neg = (1.0 - y) * margin if beta == 1.0 else (beta * (1.0 - y)) * margin
    loss = pos + neg                                          # (TB, 1)

    # Only mask padded rows of the remainder tile when one can actually exist.
    if mask_remainder:
        row = pid * tile_b + jax.lax.broadcasted_iota(jnp.int32, loss.shape, 0)
        loss = jnp.where(row < total_b, loss, 0.0)

    # Per-program partial sum -> this program's private (8, 128) output block
    # (element [0, 0] holds the partial, rest zero).  No cross-program RMW, so the
    # batch grid axis can be "parallel" (v7x 2-TC split) without races.
    partial = jnp.sum(loss)
    ii = jax.lax.broadcasted_iota(jnp.int32, (8, 128), 0)
    jj = jax.lax.broadcasted_iota(jnp.int32, (8, 128), 1)
    out_ref[...] = jnp.where((ii == 0) & (jj == 0), partial, 0.0)


def contrastive_loss(o1, o2, y, *, alpha=ALPHA, beta=BETA, m=MARGIN,
                     max_rows_per_tile=None):
    """o1, o2: (B, D) float; y: (B,) labels. Returns scalar float32 loss (mean)."""
    B, D = o1.shape
    y2d = y.reshape(-1, 1)                                    # native dtype; cast in-kernel

    in_itemsize = max(jnp.dtype(o1.dtype).itemsize, jnp.dtype(o2.dtype).itemsize)
    y_itemsize = jnp.dtype(y2d.dtype).itemsize
    row_bytes = D * in_itemsize

    # --- Tile sizing: bytes-targeted (~4 MiB per input block), VMEM-capacity aware.
    vmem_cap = _vmem_capacity_bytes()
    vmem_budget = int(0.55 * vmem_cap)                        # leave headroom on v7x's 64 MiB

    target_block_bytes = 4 << 20
    tb = max(8, (target_block_bytes // row_bytes) // 8 * 8)

    # 2 inputs x 2 pipeline buffers (+ double-buffered y) must fit the budget.
    per_row_resident = 4 * row_bytes + 2 * y_itemsize
    tb_vmem = max(8, (vmem_budget // per_row_resident) // 8 * 8)
    tb = min(tb, tb_vmem)

    if max_rows_per_tile is not None:
        tb = min(tb, max(8, (int(max_rows_per_tile) // 8) * 8))
    if B <= tb:
        tb = B                                                # single full-array tile fast path

    grid_len = pl.cdiv(B, tb)
    mask_remainder = (B % tb) != 0

    resident_bytes = tb * per_row_resident + 2 * (8 * 128 * 4)
    vmem_limit = int(min(max(2 * resident_bytes, 8 << 20), max(vmem_budget, 8 << 20)))

    kernel = functools.partial(
        _contrastive_loss_kernel,
        alpha=float(alpha), beta=float(beta), m=float(m),
        total_b=int(B), tile_b=int(tb),
        mask_remainder=bool(mask_remainder),
        sub_in_input_dtype=bool(
            o1.dtype == o2.dtype and o1.dtype in (jnp.bfloat16, jnp.float16)),
    )

    partials = pl.pallas_call(
        kernel,
        out_shape=jax.ShapeDtypeStruct((8 * grid_len, 128), jnp.float32),
        grid=(grid_len,),
        in_specs=[
            pl.BlockSpec((tb, D), lambda i: (i, 0)),          # o1 row tile
            pl.BlockSpec((tb, D), lambda i: (i, 0)),          # o2 row tile
            pl.BlockSpec((tb, 1), lambda i: (i, 0)),          # y  row tile
        ],
        out_specs=pl.BlockSpec((8, 128), lambda i: (i, 0)),   # per-program partial block
        compiler_params=pltpu.CompilerParams(
            dimension_semantics=("parallel",),                # distinct out blocks -> race-free
            vmem_limit_bytes=vmem_limit,
        ),
    )(o1, o2, y2d)

    return jnp.sum(partials) / B                              # mean over the TRUE B


def _reference(o1, o2, y, alpha=ALPHA, beta=BETA, m=MARGIN):
    o1 = o1.astype(jnp.float32)
    o2 = o2.astype(jnp.float32)
    y = y.astype(jnp.float32)
    d = jnp.sqrt(jnp.sum(jnp.square(o1 - o2 + _PAIRWISE_EPS), axis=-1))
    loss = alpha * y * d**2 + beta * (1.0 - y) * jnp.square(jnp.maximum(m - d, 0.0))
    return jnp.mean(loss)


if __name__ == "__main__":
    key = jax.random.PRNGKey(0)
    k1, k2, k3, k4, k5, k6, k7, k8, k9 = jax.random.split(key, 9)

    # Case 1: single tile, D not a multiple of 128 (full-dim block).
    B, D = 8, 32
    o1 = jax.random.normal(k1, (B, D), dtype=jnp.float32)
    o2 = jax.random.normal(k2, (B, D), dtype=jnp.float32)
    y = jax.random.bernoulli(k3, 0.5, (B,)).astype(jnp.float32)
    loss = contrastive_loss(o1, o2, y)
    jax.block_until_ready(loss)
    ref = _reference(o1, o2, y)
    assert jnp.allclose(loss, ref, rtol=1e-5, atol=1e-5), (loss, ref)

    # Case 2: multi-tile grid, no remainder (unmasked fast path, parallel axis).
    B2, D2 = 512, 128
    o1b = jax.random.normal(k4, (B2, D2), dtype=jnp.float32)
    o2b = jax.random.normal(k5, (B2, D2), dtype=jnp.float32)
    yb = jax.random.bernoulli(k6, 0.5, (B2,)).astype(jnp.float32)
    loss2 = contrastive_loss(o1b, o2b, yb, max_rows_per_tile=128)
    jax.block_until_ready(loss2)
    ref2 = _reference(o1b, o2b, yb)
    assert jnp.allclose(loss2, ref2, rtol=1e-5, atol=1e-5), (loss2, ref2)

    # Case 3: remainder-tile masking + bf16 streaming / bf16 subtract path.
    B3, D3 = 1000, 256
    o1c = jax.random.normal(k7, (B3, D3), dtype=jnp.bfloat16)
    o2c = jax.random.normal(k8, (B3, D3), dtype=jnp.bfloat16)
    yc = jax.random.bernoulli(k9, 0.5, (B3,)).astype(jnp.float32)
    loss3 = contrastive_loss(o1c, o2c, yc, max_rows_per_tile=128)
    jax.block_until_ready(loss3)
    ref3 = _reference(o1c, o2c, yc)
    assert jnp.allclose(loss3, ref3, rtol=2e-3, atol=2e-3), (loss3, ref3)

    print("KERNEL_OK")
</pallas_src>

<mosaic_0001>
module attributes {stable_mosaic.version = 11 : i64} {
  func.func @_contrastive_loss_kernel(%arg0: i32, %arg1: memref<8x32xf32, #tpu.memory_space<vmem>>, %arg2: memref<8x32xf32, #tpu.memory_space<vmem>>, %arg3: memref<8x1xf32, #tpu.memory_space<vmem>>, %arg4: memref<8x128xf32, #tpu.memory_space<vmem>>) attributes {dimension_semantics = [#tpu.dimension_semantics<parallel>], iteration_bounds = array<i64: 1>, scalar_prefetch = 0 : i64, scratch_operands = 0 : i64, tpu.core_type = #tpu.core_type<tc>, window_params = [{transform_indices = @transform_0, window_bounds = array<i64: 8, 32>}, {transform_indices = @transform_1, window_bounds = array<i64: 8, 32>}, {transform_indices = @transform_2, window_bounds = array<i64: 8, 1>}, {transform_indices = @transform_3, window_bounds = array<i64: 8, 128>}]} {
    %c0 = arith.constant 0 : index
    %c0_0 = arith.constant 0 : index
    %0 = vector.load %arg1[%c0, %c0_0] : memref<8x32xf32, #tpu.memory_space<vmem>>, vector<8x32xf32>
    %c0_1 = arith.constant 0 : index
    %c0_2 = arith.constant 0 : index
    %1 = vector.load %arg2[%c0_1, %c0_2] : memref<8x32xf32, #tpu.memory_space<vmem>>, vector<8x32xf32>
    %2 = arith.subf %0, %1 : vector<8x32xf32>
    %cst = arith.constant 9.99999997E-7 : f32
    %3 = vector.broadcast %cst : f32 to vector<8x32xf32>
    %4 = arith.addf %2, %3 : vector<8x32xf32>
    %5 = arith.mulf %4, %4 : vector<8x32xf32>
    %cst_3 = arith.constant dense<0.000000e+00> : vector<8xf32>
    %6 = vector.multi_reduction <add>, %5, %cst_3 [1] : vector<8x32xf32> to vector<8xf32>
    %7 = vector.shape_cast %6 : vector<8xf32> to vector<8x1xf32>
    %8 = math.sqrt %7 : vector<8x1xf32>
    %c0_4 = arith.constant 0 : index
    %c0_5 = arith.constant 0 : index
    %9 = vector.load %arg3[%c0_4, %c0_5] : memref<8x1xf32, #tpu.memory_space<vmem>>, vector<8x1xf32>
    %10 = arith.mulf %9, %7 : vector<8x1xf32>
    %cst_6 = arith.constant 1.000000e+00 : f32
    %11 = vector.broadcast %cst_6 : f32 to vector<8x1xf32>
    %12 = arith.subf %11, %8 : vector<8x1xf32>
    %cst_7 = arith.constant 0.000000e+00 : f32
    %13 = vector.broadcast %cst_7 : f32 to vector<8x1xf32>
    %14 = arith.maximumf %12, %13 : vector<8x1xf32>
    %15 = arith.mulf %14, %14 : vector<8x1xf32>
    %cst_8 = arith.constant 1.000000e+00 : f32
    %16 = vector.broadcast %cst_8 : f32 to vector<8x1xf32>
    %17 = arith.subf %16, %9 : vector<8x1xf32>
    %18 = arith.mulf %17, %15 : vector<8x1xf32>
    %19 = arith.addf %10, %18 : vector<8x1xf32>
    %20 = vector.shape_cast %19 : vector<8x1xf32> to vector<1x8x1xf32>
    %cst_9 = arith.constant dense<0.000000e+00> : vector<1xf32>
    %21 = vector.multi_reduction <add>, %20, %cst_9 [1, 2] : vector<1x8x1xf32> to vector<1xf32>
    %22 = vector.shape_cast %21 : vector<1xf32> to vector<1x1x1xf32>
    %23 = vector.extract %22[0, 0, 0] : f32 from vector<1x1x1xf32>
    %24 = tpu.iota {dimensions = array<i32: 0>} : vector<8x128xi32>
    %25 = tpu.iota {dimensions = array<i32: 1>} : vector<8x128xi32>
    %c0_i32 = arith.constant 0 : i32
    %26 = vector.broadcast %c0_i32 : i32 to vector<8x128xi32>
    %27 = arith.cmpi eq, %24, %26 : vector<8x128xi32>
    %c0_i32_10 = arith.constant 0 : i32
    %28 = vector.broadcast %c0_i32_10 : i32 to vector<8x128xi32>
    %29 = arith.cmpi eq, %25, %28 : vector<8x128xi32>
    %30 = arith.andi %27, %29 : vector<8x128xi1>
    %cst_11 = arith.constant 0.000000e+00 : f32
    %31 = vector.broadcast %23 : f32 to vector<8x128xf32>
    %32 = vector.broadcast %cst_11 : f32 to vector<8x128xf32>
    %33 = arith.select %30, %31, %32 : vector<8x128xi1>, vector<8x128xf32>
    %c0_12 = arith.constant 0 : index
    %c0_13 = arith.constant 0 : index
    %34 = vector.load %arg4[%c0_12, %c0_13] : memref<8x128xf32, #tpu.memory_space<vmem>>, vector<8x128xf32>
    tpu.vector_store %arg4[%c0_12, %c0_13], %33 {strides = array<i32>} : memref<8x128xf32, #tpu.memory_space<vmem>>, vector<8x128xf32>,
    return
  }
  func.func @transform_0(%arg0: i32) -> (i32, i32) {
    %c0_i32 = arith.constant 0 : i32
    %c0_i32_0 = arith.constant 0 : i32
    return %arg0, %c0_i32 : i32, i32
  }
  func.func @transform_1(%arg0: i32) -> (i32, i32) {
    %c0_i32 = arith.constant 0 : i32
    %c0_i32_0 = arith.constant 0 : i32
    return %arg0, %c0_i32 : i32, i32
  }
  func.func @transform_2(%arg0: i32) -> (i32, i32) {
    %c0_i32 = arith.constant 0 : i32
    %c0_i32_0 = arith.constant 0 : i32
    return %arg0, %c0_i32 : i32, i32
  }
  func.func @transform_3(%arg0: i32) -> (i32, i32) {
    %c0_i32 = arith.constant 0 : i32
    %c0_i32_0 = arith.constant 0 : i32
    return %arg0, %c0_i32 : i32, i32
  }
}

</mosaic_0001>

<bundles_post_ra>
// kernel: tpu_custom_call.1
= control target key start
LH: loop header
LB: loop body
LE: loop exit
PB: predicated region body
PF: predicated region fallthrough
CT: control target
= control target key end

     0   :  { %8 = vsyncpa [#allocation3], 0  ;;  %s193_s0 = inlined_call_operand.vmem [shape: f32[8,32], index: 0, kind: input, shape index: {}]   ;;  %s194_s1 = inlined_call_operand.hbm [shape: f32[8,32], index: 1, kind: input, shape index: {}]   ;;  %s195_s2 = inlined_call_operand.vmem [shape: f32[8,1], index: 2, kind: input, shape index: {}]   ;;  %s196_s3 = inlined_call_operand.hbm [shape: f32[8,128], index: 3, kind: output, shape index: {}]  }
   0x1   :  { %9 = vsyncpa [#allocation4], 0  ;;  %s141_s12 = smov [#allocation2]   ;;  %s93_s16 = scalar_lea.hbm %s194_s1, 128 }
   0x2   :  { %s18_s13 = sshll.u32 %s141_s12, 4  ;;  %p94_p0 = scmp.ne.s32.totalorder %s194_s1, %s93_s16  ;;  %s19_s13 = int_to_ptr.vmem [resolvable:$true] %s18_s13 }
   0x3   :  { %p97_p1 = scmp.lt.u32.totalorder %s93_s16, %s194_s1 }
   0x5   :  { %p99_p2 = pnand %p97_p1, %p94_p0 }
   0x7   :  { %102 = shalt.err (!%p99_p2)
}
   0x8   :  { %s103_s21 = scalar_lea.vmem %s19_s13, 128  ;;  %p108_p4 = scmp.lt.s32.totalorder %s19_s13, %s19_s13 }
   0x9   :  { %p104_p3 = scmp.ne.s32.totalorder %s19_s13, %s103_s21  ;;  %p109_p5 = scmp.lt.s32.totalorder %s103_s21, %s103_s21 }
   0xb   :  { %p110_p6 = por %p109_p5, %p108_p4 }
   0xd   :  { %p111_p7 = pnand %p110_p6, %p104_p3 }
   0xf   :  { %114 = shalt.err (!%p111_p7)
}
  0x10   :  { %21 = dma.hbm_to_vmem [thread:$0]  %s194_s1, 128, %s19_s13, [#allocation3]  }
  0x11   :  { %137 = dma.done.wait [#allocation3], 128  }
  0x12   :  { %138 = vsyncadd [#allocation3], 4294967168  ;;  %v27_v0 = vld [vmem:[%s193_s0] sm:$0xff]  ;;  %vm32_vm0 = vcmask 261120   ;;  %vm51_vm3 = vcmask 7168   ;;  %v62_v28 = vlaneseq  ;;  %s142_s0 = smov [#allocation5]  }
  0x13   :  { %v28_v1 = vld [vmem:[#allocation2] sm:$0xff] }
  0x14   :  { %v29_v2 = vsub.f32 %v27_v0, %v28_v1  ;;  %v43_v13 = vld [vmem:[%s195_s2] sm:$0xff]  ;;  %v63_v29 = vshrl.u32 %v62_v28, 7  ;;  %v65_v30 = vand.u32 127, %v62_v28  ;;  %s78_s2 = sshll.u32 %s142_s0, 4  ;;  %s79_s2 = int_to_ptr.vmem [resolvable:$true] %s78_s2 }
  0x15   :  { %v48_v15 = vsub.f32 1.0, %v43_v13  ;;  %s115_s28 = scalar_lea.vmem %s79_s2, 128  ;;  %p120_p9 = scmp.lt.s32.totalorder %s79_s2, %s79_s2 }
  0x16   :  { %v30_v3 = vadd.f32 1e-06, %v29_v2  ;;  %vm66_vm4 = vcmp.eq.s32.totalorder %v63_v29, 0  ;;  %vm67_vm5 = vcmp.eq.s32.totalorder %v65_v30, 0  ;;  %p116_p8 = scmp.ne.s32.totalorder %s79_s2, %s115_s28  ;;  %p121_p10 = scmp.lt.s32.totalorder %s115_s28, %s115_s28 }
  0x17   :  { %vm68_vm6 = vmand %vm66_vm4, %vm67_vm5 }
  0x18   :  { %v31_v4 = vmul.f32 %v30_v3, %v30_v3  ;;  %p122_p11 = por %p121_p10, %p120_p9 }
  0x1a   :  { %v33_v5 = vsel %vm32_vm0, %v31_v4, 0.0  ;;  %p123_p12 = pnand %p122_p11, %p116_p8 }
  0x1b   :  { %34 = vadd.xlane.f32.xlu0 %v33_v5 }
  0xa8   :  { %v35_v6 = vpop.xlane.xlu0 %34 }
  0xa9   :  { %91 = vrsqrt.f32 %v35_v6  ;;  %vm38_vm1 = vcmp.eq.f32.partialorder %v35_v6, inf  ;;  %v41_v9 = vand.u32 2147483648, %v35_v6  ;;  %vm40_vm2 = vcmp.eq.f32.partialorder %v35_v6, 0.0 }
  0xaa   :  { %v44_v17 = vmul.f32 %v43_v13, %v35_v6 }
  0xb3   :  { %v92_v7 = vpop.eup %91 }
  0xb4   :  { %v37_v8 = vmul.f32 %v92_v7, %v35_v6 }
  0xb6   :  { %v39_v10 = vsel %vm38_vm1, %v35_v6, %v37_v8 }
  0xb7   :  { %v42_v11 = vsel %vm40_vm2, %v41_v9, %v39_v10 }
  0xb8   :  { %v45_v12 = vsub.f32 1.0, %v42_v11 }
  0xba   :  { %v46_v14 = vmax.f32 %v45_v12, 0.0 }
  0xbc   :  { %v47_v16 = vmul.f32 %v46_v14, %v46_v14 }
  0xbe   :  { %v49_v18 = vmul.f32 %v48_v15, %v47_v16 }
  0xc0   :  { %v50_v19 = vadd.f32 %v49_v18, %v44_v17 }
  0xc2   :  { %v52_v20 = vsel %vm51_vm3, %v50_v19, 0.0 }
  0xc3   :  { %53 = vadd.xlane.f32.xlu0 %v52_v20 }
 0x150   :  { %v54_v21 = vpop.xlane.xlu0 %53 }
 0x151   :  { %v55_v22 = vrot.slane %v54_v21, 4 }
 0x153   :  { %v56_v23 = vadd.f32 %v55_v22, %v54_v21 }
 0x155   :  { %v57_v24 = vrot.slane %v56_v23, 2 }
 0x157   :  { %v58_v25 = vadd.f32 %v57_v24, %v56_v23 }
 0x159   :  { %v59_v26 = vrot.slane %v58_v25, 1 }
 0x15b   :  { %v60_v27 = vadd.f32 %v59_v26, %v58_v25 }
 0x15d   :  { %87 = vpush %v60_v27 }
 0x18e   :  { %s88_s27 = spop %87 }
 0x18f   :  { %v69_v31 = vstv %s88_s27 }
 0x190   :  { %v70_v32 = vsel %vm68_vm6, %v69_v31, 0.0 }
 0x191   :  { %71 = vst [vmem:[#allocation5] sm:$0xff] %v70_v32 }
 0x192   :  { %126 = shalt.err (!%p123_p12)
}
 0x193   :  { %s127_s4 = scalar_lea.hbm %s196_s3, 128 }
 0x194   :  { %p128_p13 = scmp.ne.s32.totalorder %s196_s3, %s127_s4  ;;  %p131_p0 = scmp.lt.u32.totalorder %s127_s4, %s196_s3 }
 0x196   :  { %p133_p1 = pnand %p131_p0, %p128_p13 }
 0x198   :  { %136 = shalt.err (!%p133_p1)
}
 0x199   :  { %81 = dma.vmem_to_hbm [thread:$0]  %s79_s2, 128, %s196_s3, [#allocation4]  }
 0x19a   :  { %139 = dma.done.wait [#allocation4], 128  }
 0x19b   :  { %140 = vsyncadd [#allocation4], 4294967168 }
 0x19c   :  { %85 = vsyncpa [#allocation3], 1 }
 0x19d   :  { %86 = vsyncpa [#allocation4], 1 }

</bundles_post_ra>
